<compile_context>
chip_gen: v7x
topology: tpu7x:2x2x1
jax: 0.10.0
libtpu: 0.0.40
codegen_flags: <defaults>
</compile_context>

<pallas_src>
import jax
import jax.numpy as jnp
import numpy as np
from jax.experimental import pallas as pl
from jax.experimental.pallas import tpu as pltpu


# ----------------------------------------------------------------------------
# Kernels: y = alpha * (x @ W + b) + delta, f32 accumulation, fused epilogue.
# ----------------------------------------------------------------------------
def _hooked_linear_kernel_acc(alpha_ref, delta_ref, x_ref, w_ref, b_ref,
                              o_ref, acc_ref):
    """Variant with a separate f32 VMEM accumulator (non-f32 output dtype)."""
    k = pl.program_id(2)

    @pl.when(k == 0)
    def _():
        acc_ref[...] = jnp.zeros_like(acc_ref)

    acc_ref[...] += jnp.dot(
        x_ref[...], w_ref[...], preferred_element_type=jnp.float32
    )

    @pl.when(k == pl.num_programs(2) - 1)
    def _():
        alpha = alpha_ref[0, 0]
        delta = delta_ref[0, 0]
        # Fold bias + hook into one FMA-style pass over the tile.
        yb = alpha * b_ref[...].astype(jnp.float32) + delta        # (1, tn)
        o_ref[...] = (alpha * acc_ref[...] + yb).astype(o_ref.dtype)


def _hooked_linear_kernel_f32out(alpha_ref, delta_ref, x_ref, w_ref, b_ref,
                                 o_ref):
    """Variant accumulating directly into the resident f32 output block."""
    k = pl.program_id(2)

    @pl.when(k == 0)
    def _():
        o_ref[...] = jnp.zeros_like(o_ref)

    o_ref[...] += jnp.dot(
        x_ref[...], w_ref[...], preferred_element_type=jnp.float32
    )

    @pl.when(k == pl.num_programs(2) - 1)
    def _():
        alpha = alpha_ref[0, 0]
        delta = delta_ref[0, 0]
        yb = alpha * b_ref[...].astype(jnp.float32) + delta        # (1, tn)
        o_ref[...] = alpha * o_ref[...] + yb


# ----------------------------------------------------------------------------
# Tile / VMEM sizing helpers.
# ----------------------------------------------------------------------------
def _round_up(x, m):
    return ((x + m - 1) // m) * m


def _vmem_limit_bytes():
    """Per-core VMEM limit with headroom for pipeline metadata/semaphores."""
    phys = 64 << 20  # conservative default (v7x per-TensorCore physical VMEM)
    try:
        info = pltpu.get_tpu_info()
        phys = int(getattr(info, "vmem_capacity_bytes", phys))
    except Exception:
        pass
    # ~85% of physical: ~54 MiB on v7x (64 MiB), ~108 MiB on v5e/v6e (128 MiB).
    return int(phys * 0.85)


# Sublane-dim (M) candidates and lane-dim (N/K) candidates.  Lane candidates
# are multiples of 256 (native 2x256 MXU on v6e/v7x); 128 only as the minimum.
_TM_CANDS = (8, 16, 32, 64, 128, 256, 512, 768, 1024, 1536, 2048)
_LANE_CANDS = (128, 256, 512, 768, 1024, 1536, 2048)


def _tile_candidates(dim, base, align, max_tile):
    cap = min(_round_up(dim, align), max_tile)
    vals = {min(c, cap) for c in base} | {cap}
    return sorted((v for v in vals if v >= align and v % align == 0),
                  reverse=True)


def _choose_tiles(m, n, k, x_bytes, w_bytes, o_bytes, use_scratch, budget):
    """Pick (tm, tn, tk) minimizing estimated HBM traffic subject to VMEM.

    With grid (i, j, k): x is re-fetched once per N-block, W once per M-block,
    so total input bytes ~= (N/tn)*M*K*bx + (M/tm)*K*N*bw.  Bigger (tm, tn)
    raises arithmetic intensity; bigger tk means fewer accumulator RMW passes
    and fewer grid steps.  This also handles the small-M (decode) case: tm
    snaps to full M so W streams exactly once.
    """
    sublane = 16 if x_bytes == 2 else 8
    tm_cands = _tile_candidates(m, _TM_CANDS, sublane, 2048)
    tn_cands = _tile_candidates(n, _LANE_CANDS, 128, 2048)
    tk_cands = _tile_candidates(k, _LANE_CANDS, 128, 2048)

    best = None
    for tm in tm_cands:
        for tn in tn_cands:
            for tk in tk_cands:
                need = (2 * tm * tk * x_bytes          # x tile, double-buffered
                        + 2 * tk * tn * w_bytes        # W tile, double-buffered
                        + 2 * tm * tn * o_bytes        # out tile, double-buffered
                        + 2 * tn * 4)                  # bias row
                if use_scratch:
                    need += tm * tn * 4                # f32 accumulator scratch
                if need > budget:
                    continue
                m_p = _round_up(m, tm)
                n_p = _round_up(n, tn)
                k_p = _round_up(k, tk)
                hbm = ((n_p // tn) * m_p * k_p * x_bytes
                       + (m_p // tm) * k_p * n_p * w_bytes
                       + m_p * n_p * o_bytes)
                score = (-hbm, tk, tm * tn)
                if best is None or score > best[0]:
                    best = (score, (tm, tn, tk))
    if best is None:
        # Smallest legal tiles always fit any sane VMEM budget.
        return (sublane, 128, 128)
    return best[1]


# ----------------------------------------------------------------------------
# Wrapper: fused alpha * (x @ W + b) + delta.
# ----------------------------------------------------------------------------
def hooked_linear(x, w, b, alpha, delta, *, cast_operands_to_bf16=False,
                  out_dtype=None):
    """Fused `alpha * (x @ w + b) + delta` on TPU.

    x: (..., H_in), w: (H_in, H_out), b: (H_out,), alpha/delta: scalars.
    Set `cast_operands_to_bf16=True` to halve HBM traffic / avoid the
    multi-pass f32 MXU decomposition when full f32 precision is not needed
    (accumulation stays f32 either way).
    """
    orig_shape = x.shape
    h_in = orig_shape[-1]
    h_out = w.shape[1]
    out_dtype = jnp.dtype(x.dtype if out_dtype is None else out_dtype)

    # Flatten leading dims in the wrapper (free layout plumbing) so the kernel
    # sees a lane-dense 2-D (M, H) slab.
    x2 = x.reshape(-1, h_in)
    if cast_operands_to_bf16 and x2.dtype == jnp.float32:
        x2 = x2.astype(jnp.bfloat16)
        w = w.astype(jnp.bfloat16)
    m = x2.shape[0]

    x_bytes = x2.dtype.itemsize
    w_bytes = w.dtype.itemsize
    o_bytes = out_dtype.itemsize
    acc_in_out = out_dtype == jnp.float32     # accumulate directly into o_ref

    vmem_limit = _vmem_limit_bytes()
    tm, tn, tk = _choose_tiles(
        m, h_out, h_in, x_bytes, w_bytes, o_bytes,
        use_scratch=not acc_in_out,
        budget=vmem_limit - (2 << 20),
    )

    # Zero-pad every dim to an exact multiple of its tile: robust for
    # arbitrary shapes (no full-extent fallback blocks, no degenerate tiles).
    # Padded K columns contribute 0 to the dot; padded M rows / N cols are
    # sliced away below.
    m_p = _round_up(m, tm)
    n_p = _round_up(h_out, tn)
    k_p = _round_up(h_in, tk)
    if (m_p, k_p) != x2.shape:
        x2 = jnp.pad(x2, ((0, m_p - m), (0, k_p - h_in)))
    w_p = w if (k_p, n_p) == w.shape else jnp.pad(
        w, ((0, k_p - h_in), (0, n_p - h_out)))
    b2 = jnp.pad(b.reshape(1, h_out), ((0, 0), (0, n_p - h_out)))

    grid = (m_p // tm, n_p // tn, k_p // tk)
    alpha_arr = jnp.asarray(alpha, jnp.float32).reshape(1, 1)
    delta_arr = jnp.asarray(delta, jnp.float32).reshape(1, 1)

    kernel = _hooked_linear_kernel_f32out if acc_in_out else _hooked_linear_kernel_acc
    scratch = () if acc_in_out else (pltpu.VMEM((tm, tn), jnp.float32),)

    out = pl.pallas_call(
        kernel,
        out_shape=jax.ShapeDtypeStruct((m_p, n_p), out_dtype),
        grid_spec=pltpu.PrefetchScalarGridSpec(
            num_scalar_prefetch=0,
            grid=grid,
            in_specs=[
                # alpha / delta: (1,1) scalars in SMEM — no vector-path cost.
                pl.BlockSpec(memory_space=pltpu.MemorySpace.SMEM),
                pl.BlockSpec(memory_space=pltpu.MemorySpace.SMEM),
                pl.BlockSpec((tm, tk), lambda i, j, k: (i, k)),   # x tile
                pl.BlockSpec((tk, tn), lambda i, j, k: (k, j)),   # W tile
                pl.BlockSpec((1, tn), lambda i, j, k: (0, j)),    # bias tile
            ],
            out_specs=pl.BlockSpec((tm, tn), lambda i, j, k: (i, j)),
            scratch_shapes=list(scratch),
        ),
        compiler_params=pltpu.CompilerParams(
            # M/N parallel (megacore / 2-TC sharding), K reduction arbitrary.
            dimension_semantics=("parallel", "parallel", "arbitrary"),
            vmem_limit_bytes=vmem_limit,
        ),
    )(alpha_arr, delta_arr, x2, w_p, b2)

    out = out[:m, :h_out]
    return out.reshape(orig_shape[:-1] + (h_out,))


# ----------------------------------------------------------------------------
# CustomHook wrapper: Python glue only (enabled flag, tuple dispatch).
# ----------------------------------------------------------------------------
class HookedLinear:
    """Concrete CustomHook(module=Linear, hook_fn=alpha*t+delta).

    When enabled, the module + hook are executed as ONE fused Pallas kernel.
    When disabled, the same kernel runs with the identity hook (alpha=1, d=0).
    """
    # TODO(synk): CustomHook accepts an arbitrary Python `hook_fn`; only the
    # affine-steering hook (alpha*t + delta) is fused into the kernel here.

    def __init__(self, w, b, alpha, delta):
        self.w = w
        self.b = b
        self.alpha = alpha
        self.delta = delta
        self.enabled = True

    def __call__(self, x):
        if self.enabled:
            out = hooked_linear(x, self.w, self.b, self.alpha, self.delta)
        else:
            out = hooked_linear(x, self.w, self.b, 1.0, 0.0)
        # Tuple dispatch of the original CustomHook: the wrapped Linear
        # returns a single tensor, so this branch is trivial here.
        if isinstance(out, tuple):
            return (out[0],) + out[1:]
        return out


if __name__ == "__main__":
    # Small deterministic config: batch=2, seq=8, hidden=32.
    B, S, H = 2, 8, 32
    key = jax.random.PRNGKey(0)
    kx, kw, kb = jax.random.split(key, 3)

    x = jax.random.normal(kx, (B, S, H), dtype=jnp.float32)
    w = jax.random.normal(kw, (H, H), dtype=jnp.float32) * 0.1
    b = jax.random.normal(kb, (H,), dtype=jnp.float32) * 0.1
    alpha, delta = 1.5, 0.25

    hook = HookedLinear(w, b, alpha, delta)
    y = jax.block_until_ready(hook(x))

    # Reference (pure JAX) check of forward semantics: hook_fn(linear(x)).
    ref = alpha * (x @ w + b[None, None, :]) + delta
    np.testing.assert_allclose(np.asarray(y), np.asarray(ref),
                               rtol=1e-4, atol=1e-4)

    # Disabled path: plain module output.
    hook.enabled = False
    y_off = jax.block_until_ready(hook(x))
    np.testing.assert_allclose(np.asarray(y_off),
                               np.asarray(x @ w + b[None, None, :]),
                               rtol=1e-4, atol=1e-4)

    # Non-divisible shape path (exercises padding + slicing, bf16 output /
    # f32 scratch variant) at small scale.
    x_odd = jax.random.normal(kx, (3, 5, H), dtype=jnp.bfloat16)
    w_odd = (jax.random.normal(kw, (H, 48), dtype=jnp.float32) * 0.1
             ).astype(jnp.bfloat16)
    b_odd = (jax.random.normal(kb, (48,), dtype=jnp.float32) * 0.1
             ).astype(jnp.bfloat16)
    y_odd = jax.block_until_ready(
        hooked_linear(x_odd, w_odd, b_odd, alpha, delta))
    ref_odd = (alpha * (x_odd.astype(jnp.float32) @ w_odd.astype(jnp.float32)
                        + b_odd.astype(jnp.float32)[None, None, :]) + delta)
    np.testing.assert_allclose(np.asarray(y_odd, dtype=np.float32),
                               np.asarray(ref_odd), rtol=2e-2, atol=2e-2)

    print("KERNEL_OK")
</pallas_src>

<mosaic_0001>
module attributes {stable_mosaic.version = 11 : i64} {
  func.func @_hooked_linear_kernel_f32out(%arg0: i32, %arg1: i32, %arg2: i32, %arg3: memref<1x1xf32, #tpu.memory_space<smem>>, %arg4: memref<1x1xf32, #tpu.memory_space<smem>>, %arg5: memref<16x128xf32, #tpu.memory_space<vmem>>, %arg6: memref<128x128xf32, #tpu.memory_space<vmem>>, %arg7: memref<1x128xf32, #tpu.memory_space<vmem>>, %arg8: memref<16x128xf32, #tpu.memory_space<vmem>>) attributes {dimension_semantics = [#tpu.dimension_semantics<parallel>, #tpu.dimension_semantics<parallel>, #tpu.dimension_semantics<arbitrary>], iteration_bounds = array<i64: 1, 1, 1>, scalar_prefetch = 0 : i64, scratch_operands = 0 : i64, tpu.core_type = #tpu.core_type<tc>, window_params = [{transform_indices = @transform_0, window_bounds = array<i64: 1, 1>}, {transform_indices = @transform_1, window_bounds = array<i64: 1, 1>}, {transform_indices = @transform_2, window_bounds = array<i64: 16, 128>}, {transform_indices = @transform_3, window_bounds = array<i64: 128, 128>}, {transform_indices = @transform_4, window_bounds = array<i64: 1, 128>}, {transform_indices = @transform_5, window_bounds = array<i64: 16, 128>}]} {
    %c0_i32 = arith.constant 0 : i32
    %0 = arith.cmpi eq, %arg2, %c0_i32 : i32
    %1 = arith.extui %0 : i1 to i32
    %c0_i32_0 = arith.constant 0 : i32
    %2 = arith.cmpi ne, %1, %c0_i32_0 : i32
    scf.if %2 {
      %cst_10 = arith.constant 0.000000e+00 : f32
      %12 = vector.broadcast %cst_10 : f32 to vector<16x128xf32>
      %c0_11 = arith.constant 0 : index
      %c0_12 = arith.constant 0 : index
      %13 = vector.load %arg8[%c0_11, %c0_12] : memref<16x128xf32, #tpu.memory_space<vmem>>, vector<16x128xf32>
      tpu.vector_store %arg8[%c0_11, %c0_12], %12 {strides = array<i32>} : memref<16x128xf32, #tpu.memory_space<vmem>>, vector<16x128xf32>,
    } else {
    }
    %c0 = arith.constant 0 : index
    %c0_1 = arith.constant 0 : index
    %3 = vector.load %arg8[%c0, %c0_1] : memref<16x128xf32, #tpu.memory_space<vmem>>, vector<16x128xf32>
    %c0_2 = arith.constant 0 : index
    %c0_3 = arith.constant 0 : index
    %4 = vector.load %arg5[%c0_2, %c0_3] : memref<16x128xf32, #tpu.memory_space<vmem>>, vector<16x128xf32>
    %c0_4 = arith.constant 0 : index
    %c0_5 = arith.constant 0 : index
    %5 = vector.load %arg6[%c0_4, %c0_5] : memref<128x128xf32, #tpu.memory_space<vmem>>, vector<128x128xf32>
    %cst = arith.constant dense<0.000000e+00> : vector<16x128xf32>
    %6 = tpu.matmul %4, %5, %cst {dimension_numbers = #tpu.dot_dimension_numbers<[1], [0], [0], [1], [0, 0, 1, 1], [], []>} : vector<16x128xf32>, vector<128x128xf32>, vector<16x128xf32> -> vector<16x128xf32>
    %7 = arith.addf %3, %6 : vector<16x128xf32>
    %c0_6 = arith.constant 0 : index
    %c0_7 = arith.constant 0 : index
    %8 = vector.load %arg8[%c0_6, %c0_7] : memref<16x128xf32, #tpu.memory_space<vmem>>, vector<16x128xf32>
    tpu.vector_store %arg8[%c0_6, %c0_7], %7 {strides = array<i32>} : memref<16x128xf32, #tpu.memory_space<vmem>>, vector<16x128xf32>,
    %c0_i32_8 = arith.constant 0 : i32
    %9 = arith.cmpi eq, %arg2, %c0_i32_8 : i32
    %10 = arith.extui %9 : i1 to i32
    %c0_i32_9 = arith.constant 0 : i32
    %11 = arith.cmpi ne, %10, %c0_i32_9 : i32
    scf.if %11 {
      %c0_10 = arith.constant 0 : index
      %c0_11 = arith.constant 0 : index
      %12 = memref.load %arg3[%c0_10, %c0_11] : memref<1x1xf32, #tpu.memory_space<smem>>
      %c0_12 = arith.constant 0 : index
      %c0_13 = arith.constant 0 : index
      %13 = memref.load %arg4[%c0_12, %c0_13] : memref<1x1xf32, #tpu.memory_space<smem>>
      %c0_14 = arith.constant 0 : index
      %c0_15 = arith.constant 0 : index
      %14 = vector.load %arg7[%c0_14, %c0_15] : memref<1x128xf32, #tpu.memory_space<vmem>>, vector<1x128xf32>
      %15 = vector.broadcast %12 : f32 to vector<1x128xf32>
      %16 = arith.mulf %15, %14 : vector<1x128xf32>
      %17 = vector.broadcast %13 : f32 to vector<1x128xf32>
      %18 = arith.addf %16, %17 : vector<1x128xf32>
      %c0_16 = arith.constant 0 : index
      %c0_17 = arith.constant 0 : index
      %19 = vector.load %arg8[%c0_16, %c0_17] : memref<16x128xf32, #tpu.memory_space<vmem>>, vector<16x128xf32>
      %20 = vector.broadcast %12 : f32 to vector<16x128xf32>
      %21 = arith.mulf %20, %19 : vector<16x128xf32>
      %22 = vector.broadcast %18 : vector<1x128xf32> to vector<16x128xf32>
      %23 = arith.addf %21, %22 : vector<16x128xf32>
      %c0_18 = arith.constant 0 : index
      %c0_19 = arith.constant 0 : index
      %24 = vector.load %arg8[%c0_18, %c0_19] : memref<16x128xf32, #tpu.memory_space<vmem>>, vector<16x128xf32>
      tpu.vector_store %arg8[%c0_18, %c0_19], %23 {strides = array<i32>} : memref<16x128xf32, #tpu.memory_space<vmem>>, vector<16x128xf32>,
    } else {
    }
    return
  }
  func.func @transform_0(%arg0: i32, %arg1: i32, %arg2: i32) -> (i32, i32) {
    %c0_i32 = arith.constant 0 : i32
    %c0_i32_0 = arith.constant 0 : i32
    %c0_i32_1 = arith.constant 0 : i32
    return %c0_i32, %c0_i32_0 : i32, i32
  }
  func.func @transform_1(%arg0: i32, %arg1: i32, %arg2: i32) -> (i32, i32) {
    %c0_i32 = arith.constant 0 : i32
    %c0_i32_0 = arith.constant 0 : i32
    %c0_i32_1 = arith.constant 0 : i32
    return %c0_i32, %c0_i32_0 : i32, i32
  }
  func.func @transform_2(%arg0: i32, %arg1: i32, %arg2: i32) -> (i32, i32) {
    %c0_i32 = arith.constant 0 : i32
    return %arg0, %arg2 : i32, i32
  }
  func.func @transform_3(%arg0: i32, %arg1: i32, %arg2: i32) -> (i32, i32) {
    %c0_i32 = arith.constant 0 : i32
    return %arg2, %arg1 : i32, i32
  }
  func.func @transform_4(%arg0: i32, %arg1: i32, %arg2: i32) -> (i32, i32) {
    %c0_i32 = arith.constant 0 : i32
    %c0_i32_0 = arith.constant 0 : i32
    return %c0_i32, %arg1 : i32, i32
  }
  func.func @transform_5(%arg0: i32, %arg1: i32, %arg2: i32) -> (i32, i32) {
    %c0_i32 = arith.constant 0 : i32
    return %arg0, %arg1 : i32, i32
  }
}

</mosaic_0001>

<bundles_post_ra>
// kernel: tpu_custom_call.1
= control target key start
LH: loop header
LB: loop body
LE: loop exit
PB: predicated region body
PF: predicated region fallthrough
CT: control target
= control target key end

     0   :  { %12 = vsyncpa [#allocation5], 0  ;;  %s450_s0 = inlined_call_operand.<no memory space> [shape: f32[1,1], index: 0, kind: input, shape index: {}]   ;;  %s451_s1 = inlined_call_operand.<no memory space> [shape: f32[1,1], index: 1, kind: input, shape index: {}]   ;;  %s452_s2 = inlined_call_operand.hbm [shape: f32[16,128], index: 2, kind: input, shape index: {}]   ;;  %s453_s3 = inlined_call_operand.hbm [shape: f32[128,128], index: 3, kind: input, shape index: {}]   ;;  %s454_s4 = inlined_call_operand.vmem [shape: f32[1,128], index: 4, kind: input, shape index: {}]   ;;  %s455_s5 = inlined_call_operand.hbm [shape: f32[16,128], index: 5, kind: output, shape index: {}]  }
   0x1   :  { %13 = vsyncpa [#allocation8], 0 }
   0x2   :  { %14 = vsyncpa [#allocation6], 0  ;;  %s361_s18 = smov [#allocation4]   ;;  %s289_s22 = scalar_lea.hbm %s452_s2, 256 }
   0x3   :  { %s24_s19 = sshll.u32 %s361_s18, 4  ;;  %p290_p0 = scmp.ne.s32.totalorder %s452_s2, %s289_s22  ;;  %s25_s19 = int_to_ptr.vmem [resolvable:$true] %s24_s19 }
   0x4   :  { %p293_p1 = scmp.lt.u32.totalorder %s289_s22, %s452_s2 }
   0x6   :  { %p295_p2 = pnand %p293_p1, %p290_p0 }
   0x8   :  { %298 = shalt.err (!%p295_p2)
}
   0x9   :  { %s299_s27 = scalar_lea.vmem %s25_s19, 256  ;;  %p304_p4 = scmp.lt.s32.totalorder %s25_s19, %s25_s19 }
   0xa   :  { %p300_p3 = scmp.ne.s32.totalorder %s25_s19, %s299_s27  ;;  %p305_p5 = scmp.lt.s32.totalorder %s299_s27, %s299_s27 }
   0xc   :  { %p306_p6 = por %p305_p5, %p304_p4 }
   0xe   :  { %p307_p7 = pnand %p306_p6, %p300_p3 }
  0x10   :  { %310 = shalt.err (!%p307_p7)
}
  0x11   :  { %s362_s28 = smov 128   ;;  %s363_s29 = smov 8  }
  0x12   :  { %30 = dma.hbm_to_vmem [thread:$0]  %s452_s2, 256, %s25_s19, [#allocation5], %s362_s28, %s362_s28, %s363_s29  }
  0x13   :  { %s364_s7 = smov [#allocation7]   ;;  %s311_s11 = scalar_lea.hbm %s453_s3, 2048 }
  0x14   :  { %s36_s8 = sshll.u32 %s364_s7, 4  ;;  %p312_p8 = scmp.ne.s32.totalorder %s453_s3, %s311_s11  ;;  %s37_s8 = int_to_ptr.vmem [resolvable:$true] %s36_s8 }
  0x15   :  { %p315_p9 = scmp.lt.u32.totalorder %s311_s11, %s453_s3 }
  0x17   :  { %p317_p10 = pnand %p315_p9, %p312_p8 }
  0x19   :  { %320 = shalt.err (!%p317_p10)
}
  0x1a   :  { %s321_s16 = scalar_lea.vmem %s37_s8, 2048  ;;  %p326_p12 = scmp.lt.s32.totalorder %s37_s8, %s37_s8 }
  0x1b   :  { %p322_p11 = scmp.ne.s32.totalorder %s37_s8, %s321_s16  ;;  %p327_p13 = scmp.lt.s32.totalorder %s321_s16, %s321_s16 }
  0x1d   :  { %p328_p0 = por %p327_p13, %p326_p12 }
  0x1f   :  { %p329_p1 = pnand %p328_p0, %p322_p11 }
  0x21   :  { %332 = shalt.err (!%p329_p1)
}
  0x22   :  { %42 = dma.hbm_to_vmem [thread:$0]  %s453_s3, 2048, %s37_s8, [#allocation8], %s362_s28, %s362_s28, %s363_s29  }
  0x23   :  { %355 = dma.done.wait [#allocation5], 256  }
  0x24   :  { %356 = vsyncadd [#allocation5], 4294967040 }
  0x25   :  { %357 = dma.done.wait [#allocation8], 2048  }
  0x26   :  { %358 = vsyncadd [#allocation8], 4294965248  ;;  %v61_v0 = vld [vmem:[#allocation7] sm:$0xff]  ;;  %v62_v1 = vld [vmem:[#allocation7 + $0x8] sm:$0xff]  ;;  %v171_v26 = vlaneseq  ;;  %v162_v28 = vstv %s450_s0  ;;  %v164_v31 = vstv %s451_s1  ;;  %s365_s23 = smov [#allocation9]  }
  0x27   :  { %v63_v2 = vld [vmem:[#allocation7 + $0x10] sm:$0xff]  ;;  %v251_v3 = vpack.c.bf16 %v62_v1, %v61_v0  ;;  %v64_v4 = vld [vmem:[#allocation7 + $0x18] sm:$0xff]  ;;  %v65_v6 = vld [vmem:[#allocation7 + $0x20] sm:$0xff]  ;;  %s185_s24 = sshll.u32 %s365_s23, 4  ;;  %s186_s24 = int_to_ptr.vmem [resolvable:$true] %s185_s24 }
  0x28   :  { %v255_v5 = vpack.c.bf16 %v64_v4, %v63_v2  ;;  %v66_v7 = vld [vmem:[#allocation7 + $0x28] sm:$0xff]  ;;  %v59_v9 = vld [vmem:[#allocation4] sm:$0xff]  ;;  %v68_v11 = vld [vmem:[#allocation7 + $0x38] sm:$0xff]  ;;  %v172_v30 = vshrl.u32 %v171_v26, 7  ;;  %s333_s0 = scalar_lea.vmem %s186_s24, 256  ;;  %p338_p3 = scmp.lt.s32.totalorder %s186_s24, %s186_s24 }
  0x29   :  { %252 = vmatprep.subr.bf16.mxu0 %v251_v3  ;;  %v259_v8 = vpack.c.bf16 %v66_v7, %v65_v6  ;;  %v67_v10 = vld [vmem:[#allocation7 + $0x30] sm:$0xff]  ;;  %248 = vmatprep.mubr.f32.mxu0 %v59_v9  ;;  %v69_v13 = vld [vmem:[#allocation7 + $0x40] sm:$0xff]  ;;  %v70_v14 = vld [vmem:[#allocation7 + $0x48] sm:$0xff]  ;;  %p334_p2 = scmp.ne.s32.totalorder %s186_s24, %s333_s0  ;;  %p339_p4 = scmp.lt.s32.totalorder %s333_s0, %s333_s0 }
  0x2a   :  { %254 = vmatpush3.bf16.msra.mxu0 %v251_v3  ;;  %v263_v12 = vpack.c.bf16 %v68_v11, %v67_v10  ;;  %v267_v15 = vpack.c.bf16 %v70_v14, %v69_v13  ;;  %v71_v16 = vld [vmem:[#allocation7 + $0x50] sm:$0xff]  ;;  %v72_v17 = vld [vmem:[#allocation7 + $0x58] sm:$0xff]  ;;  %v73_v19 = vld [vmem:[#allocation7 + $0x60] sm:$0xff]  ;;  %v173_v33 = vsub.s32 0, %v172_v30 }
  0x2b   :  { %256 = vmatprep.subr.bf16.mxu0 %v255_v5  ;;  %v271_v18 = vpack.c.bf16 %v72_v17, %v71_v16  ;;  %v74_v20 = vld [vmem:[#allocation7 + $0x68] sm:$0xff]  ;;  %v75_v22 = vld [vmem:[#allocation7 + $0x70] sm:$0xff]  ;;  %v76_v23 = vld [vmem:[#allocation7 + $0x78] sm:$0xff]  ;;  %p340_p5 = por %p339_p4, %p338_p3 }
  0x2c   :  { %v275_v21 = vpack.c.bf16 %v74_v20, %v73_v19  ;;  %v279_v24 = vpack.c.bf16 %v76_v23, %v75_v22  ;;  %v60_v25 = vld [vmem:[#allocation4 + $0x8] sm:$0xff]  ;;  %v161_v27 = vld [vmem:[%s454_s4] sm:$0x1] }
  0x2d   :  { %v163_v29 = vmul.f32 %v162_v28, %v161_v27  ;;  %p341_p6 = pnand %p340_p5, %p334_p2 }
  0x2e   :  { %258 = vmatpush3.bf16.msra.mxu0 %v255_v5 }
  0x2f   :  { %260 = vmatprep.subr.bf16.mxu0 %v259_v8  ;;  %v165_v32 = vadd.f32 %v164_v31, %v163_v29 }
  0x31   :  { %v174_v36 = vrot.slane %v165_v32, %v173_v33 }
  0x32   :  { %262 = vmatpush3.bf16.msra.mxu0 %v259_v8 }
  0x33   :  { %264 = vmatprep.subr.bf16.mxu0 %v263_v12 }
  0x36   :  { %266 = vmatpush3.bf16.msra.mxu0 %v263_v12 }
  0x37   :  { %268 = vmatprep.subr.bf16.mxu0 %v267_v15 }
  0x3a   :  { %270 = vmatpush3.bf16.msra.mxu0 %v267_v15 }
  0x3b   :  { %272 = vmatprep.subr.bf16.mxu0 %v271_v18 }
  0x3e   :  { %274 = vmatpush3.bf16.msra.mxu0 %v271_v18 }
  0x3f   :  { %276 = vmatprep.subr.bf16.mxu0 %v275_v21 }
  0x42   :  { %278 = vmatpush3.bf16.msra.mxu0 %v275_v21 }
  0x43   :  { %280 = vmatprep.subr.bf16.mxu0 %v279_v24 }
  0x46   :  { %282 = vmatpush3.bf16.msra.mxu0 %v279_v24 }
  0x49   :  { %249 = vmatmul.mubr.f32.vlgmr.msra.gmra.mrb[0].mxu0 %v60_v25 }
 0x11c   :  { %v250_v34 = vpop.f32.mrb[0].mxu0 }
 0x11d   :  { %v143_v35 = vpop.f32.mrb[1].mxu0  ;;  %v169_v37 = vmul.f32 %v250_v34, %v162_v28 }
 0x11e   :  { %v168_v38 = vmul.f32 %v162_v28, %v143_v35 }
 0x11f   :  { %v177_v39 = vadd.f32 %v174_v36, %v169_v37 }
 0x120   :  { %v176_v40 = vadd.f32 %v174_v36, %v168_v38 }
 0x121   :  { %179 = vst [vmem:[#allocation9 + $0x8] sm:$0xff] %v177_v39 }
 0x122   :  { %178 = vst [vmem:[#allocation9] sm:$0xff] %v176_v40 }
 0x123   :  { %344 = shalt.err (!%p341_p6)
}
 0x124   :  { %s345_s25 = scalar_lea.hbm %s455_s5, 256 }
 0x125   :  { %p346_p7 = scmp.ne.s32.totalorder %s455_s5, %s345_s25  ;;  %p349_p8 = scmp.lt.u32.totalorder %s345_s25, %s455_s5 }
 0x127   :  { %p351_p9 = pnand %p349_p8, %p346_p7 }
 0x129   :  { %354 = shalt.err (!%p351_p9)
}
 0x12a   :  { %191 = dma.vmem_to_hbm [thread:$0]  %s186_s24, 256, %s455_s5, [#allocation6], %s362_s28, %s362_s28, %s363_s29  }
 0x12b   :  { %359 = dma.done.wait [#allocation6], 256  }
 0x12c   :  { %360 = vsyncadd [#allocation6], 4294967040 }
 0x12d   :  { %195 = vsyncpa [#allocation5], 1 }
 0x12e   :  { %196 = vsyncpa [#allocation8], 1 }
 0x12f   :  { %197 = vsyncpa [#allocation6], 1 }

</bundles_post_ra>
